<compile_context>
chip_gen: v7x
topology: tpu7x:2x2x1
jax: 0.10.0
libtpu: 0.0.40
codegen_flags: <defaults>
</compile_context>

<pallas_src>
import jax
import jax.numpy as jnp
import numpy as np
from jax.experimental import pallas as pl
from jax.experimental.pallas import tpu as pltpu

# ----- hyperparameters (consistent with the module __init__) -----
E_S = 16            # statement_embed_dim
E_M = 8             # meta_embed_dim
K_NUM = 8           # statement_kernel_num
KSIZES = (2, 3, 4)  # kernel_size
MAXK = max(KSIZES)
H = 5               # meta_lstm_hidden_dim
H2 = 2 * H          # fwd|bwd fused hidden width (= layer-1 input width)
OUT = 4             # output_size
L = 12              # statement sequence length
C3 = len(KSIZES) * K_NUM           # 24 conv features
META_QUERY_DIM = 4                 # num_layers * num_directions
FEAT = C3 + META_QUERY_DIM         # 28
WIN_K = MAXK * E_S                 # 64  (im2col window width)

# ----- kernel batching / packing constants -----
BB = 8                             # examples per grid step (sublane batch)

# f32 constant-slab row layout (block starts sublane-aligned where it matters)
R_BC, R_BLAB, R_B0, R_B1, R_WLM = 0, 1, 2, 3, 4
R_W0, R_W1, R_WLC, R_MASK = 8, 16, 32, 56
CONST_ROWS = R_MASK + BB * L       # 152
CONST_LANES = 32                   # >= 3*H2


# ---------------------------------------------------------------------------
# Fused kernel: conv+relu+maxpool (x3) + 2-layer bi-LSTM step + split label FC
# ---------------------------------------------------------------------------
def _fused_kernel(win_ref, meta_ref, wc_ref, cst_ref, out_ref):
    f32 = jnp.float32

    # --- statement conv branch: ONE bf16 MXU matmul over BB examples x L steps
    # win rows are time-major within the block: row = t*BB + b.
    z = jnp.dot(win_ref[...], wc_ref[...], preferred_element_type=f32)   # [L*BB, C3]
    bc = cst_ref[R_BC:R_BC + 1, 0:C3]                                    # [1, C3]
    mask = cst_ref[R_MASK:R_MASK + L * BB, 0:C3]                         # [L*BB, C3]
    # ReLU >= 0, and t=0 is always valid => zero-masking invalid t is max-safe.
    act = jnp.maximum(z + bc, 0.0) * mask
    # per-example max over time: fold aligned 8-row time slices (pure VPU maxima)
    conv_max = act[0:BB, :]
    for t in range(1, L):
        conv_max = jnp.maximum(conv_max, act[t * BB:(t + 1) * BB, :])    # [BB, C3]

    # --- meta 2-layer bidirectional LSTM, single time step, h0 = c0 = 0 ---
    # gates packed (i | g | o) x (fwd | bwd) on lanes -> one matmul per layer.
    def lstm_layer(x, r_w, n_w, r_b):
        w = cst_ref[r_w:r_w + n_w, 0:3 * H2]
        b = cst_ref[r_b:r_b + 1, 0:3 * H2]
        g = jnp.dot(x, w, preferred_element_type=f32) + b                # [BB, 3*H2]
        gi = g[:, 0:H2]
        gg = g[:, H2:2 * H2]
        go = g[:, 2 * H2:3 * H2]
        # c = sigmoid(i)*tanh(g)  (forget gate * c0 == 0 drops out); h = sigmoid(o)*tanh(c)
        return jax.nn.sigmoid(go) * jnp.tanh(jax.nn.sigmoid(gi) * jnp.tanh(gg))

    h0 = lstm_layer(meta_ref[...], R_W0, E_M, R_B0)                      # [BB, H2] = [fwd|bwd]
    h1 = lstm_layer(h0, R_W1, H2, R_B1)                                  # [BB, H2]

    # per-(layer, direction) max over hidden units -> [BB, 4] meta features
    meta_feat = jnp.concatenate(
        [jnp.max(h0[:, 0:H], axis=1, keepdims=True),
         jnp.max(h0[:, H:H2], axis=1, keepdims=True),
         jnp.max(h1[:, 0:H], axis=1, keepdims=True),
         jnp.max(h1[:, H:H2], axis=1, keepdims=True)], axis=1)

    # --- split label Linear (no feature concat): conv part + meta part + bias
    w_lab_c = cst_ref[R_WLC:R_WLC + C3, 0:OUT]                           # [C3, OUT]
    w_lab_m = cst_ref[R_WLM:R_WLM + META_QUERY_DIM, 0:OUT]               # [4, OUT]
    b_lab = cst_ref[R_BLAB:R_BLAB + 1, 0:OUT]                            # [1, OUT]
    out_ref[...] = (jnp.dot(conv_max, w_lab_c, preferred_element_type=f32)
                    + jnp.dot(meta_feat, w_lab_m, preferred_element_type=f32)
                    + b_lab)


# ---------------------------------------------------------------------------
# Forward wrapper: host-side im2col / layout plumbing + one batched pallas_call
# ---------------------------------------------------------------------------
@jax.jit
def cnn_with_meta_forward(packed, statements, metas):
    """statements: [B, L, E_S] f32, metas: [B, E_M] f32 -> [B, OUT] f32.
    Each batch row is an independent CNN_with_meta forward."""
    B = statements.shape[0]
    assert B % BB == 0, "batch must be a multiple of BB"
    G = B // BB

    # im2col windows + bf16 cast, hoisted out of the kernel (pure layout plumbing)
    s = statements.astype(jnp.bfloat16)                                       # [B, L, E_S]
    spad = jnp.pad(s, ((0, 0), (0, MAXK - 1), (0, 0)))                        # [B, L+3, E_S]
    win = jnp.concatenate([spad[:, r:r + L, :] for r in range(MAXK)], axis=2)  # [B, L, WIN_K]
    # time-major within each grid block of BB examples: row = ((g*L + t)*BB + b)
    win = win.reshape(G, BB, L, WIN_K).transpose(0, 2, 1, 3)                  # [G, L, BB, WIN_K]
    win2d = win.reshape(B * L, WIN_K)

    return pl.pallas_call(
        _fused_kernel,
        out_shape=jax.ShapeDtypeStruct((B, OUT), jnp.float32),
        grid=(G,),
        in_specs=[
            pl.BlockSpec((BB * L, WIN_K), lambda g: (g, 0)),                  # per-batch windows (bf16)
            pl.BlockSpec((BB, E_M), lambda g: (g, 0)),                        # per-batch meta (f32)
            pl.BlockSpec((WIN_K, C3), lambda g: (0, 0)),                      # packed conv weight (bf16)
            pl.BlockSpec((CONST_ROWS, CONST_LANES), lambda g: (0, 0)),        # packed f32 constants
        ],
        out_specs=pl.BlockSpec((BB, OUT), lambda g: (g, 0)),
        compiler_params=pltpu.CompilerParams(
            dimension_semantics=("parallel",)),      # megacore batch split on v7x
    )(win2d, metas, packed['wc'], packed['cst'])


# ---------------------------------------------------------------------------
# Parameters (PyTorch layout) and one-time packing into the two constant slabs
# ---------------------------------------------------------------------------
def init_params(key):
    keys = list(jax.random.split(key, 40))
    nxt = iter(keys)

    def rnd(shape):
        return jax.random.normal(next(nxt), shape, jnp.float32) * 0.1

    params = {}
    # Conv2d(1, K_NUM, (k, E_S)): weight [K_NUM, 1, k, E_S], bias [K_NUM]
    params['convs'] = [(rnd((K_NUM, 1, k, E_S)), rnd((K_NUM,))) for k in KSIZES]
    # LSTM (W_hh omitted: it multiplies the zero initial hidden state)
    params['lstm'] = {
        'w_ih_l0': rnd((4 * H, E_M)), 'b_ih_l0': rnd((4 * H,)), 'b_hh_l0': rnd((4 * H,)),
        'w_ih_l0_rev': rnd((4 * H, E_M)), 'b_ih_l0_rev': rnd((4 * H,)), 'b_hh_l0_rev': rnd((4 * H,)),
        'w_ih_l1': rnd((4 * H, H2)), 'b_ih_l1': rnd((4 * H,)), 'b_hh_l1': rnd((4 * H,)),
        'w_ih_l1_rev': rnd((4 * H, H2)), 'b_ih_l1_rev': rnd((4 * H,)), 'b_hh_l1_rev': rnd((4 * H,)),
    }
    params['label_w'] = rnd((OUT, FEAT))
    params['label_b'] = rnd((OUT,))
    return params


def pack_params(params):
    """One-time host-side repack into (a) a bf16 conv-weight slab and (b) a single
    f32 constant slab with static, mostly sublane-aligned row offsets."""
    # (a) conv weight, zero-padded per kernel size: [WIN_K, C3] bf16
    wc = np.zeros((WIN_K, C3), np.float32)
    bc = np.zeros((C3,), np.float32)
    for j, (k, (wconv, bvec)) in enumerate(zip(KSIZES, params['convs'])):
        wc[:k * E_S, j * K_NUM:(j + 1) * K_NUM] = np.asarray(wconv).reshape(K_NUM, k * E_S).T
        bc[j * K_NUM:(j + 1) * K_NUM] = np.asarray(bvec)

    # (b) f32 constant slab
    cst = np.zeros((CONST_ROWS, CONST_LANES), np.float32)
    cst[R_BC, :C3] = bc
    cst[R_BLAB, :OUT] = np.asarray(params['label_b'])
    wlab = np.asarray(params['label_w'])                   # [OUT, FEAT]
    cst[R_WLC:R_WLC + C3, :OUT] = wlab[:, :C3].T           # conv part of the label weight
    cst[R_WLM:R_WLM + META_QUERY_DIM, :OUT] = wlab[:, C3:].T   # meta part

    # LSTM: gate-major (i, g, o) packing, fwd|bwd lanes fused, forget dropped (c0 == 0)
    p = params['lstm']
    GATES = (0, 2, 3)   # PyTorch fused gate row order is [i | f | g | o]

    def pack_layer(w_f, bi_f, bh_f, w_b, bi_b, bh_b):
        w_f = np.asarray(w_f); w_b = np.asarray(w_b)
        b_f = np.asarray(bi_f) + np.asarray(bh_f)
        b_b = np.asarray(bi_b) + np.asarray(bh_b)
        in_dim = w_f.shape[1]
        W = np.zeros((in_dim, 3 * H2), np.float32)
        bvec = np.zeros((3 * H2,), np.float32)
        for gi, g in enumerate(GATES):
            rows = slice(g * H, (g + 1) * H)
            W[:, gi * H2:gi * H2 + H] = w_f[rows, :].T
            W[:, gi * H2 + H:(gi + 1) * H2] = w_b[rows, :].T
            bvec[gi * H2:gi * H2 + H] = b_f[rows]
            bvec[gi * H2 + H:(gi + 1) * H2] = b_b[rows]
        return W, bvec

    W0, b0 = pack_layer(p['w_ih_l0'], p['b_ih_l0'], p['b_hh_l0'],
                        p['w_ih_l0_rev'], p['b_ih_l0_rev'], p['b_hh_l0_rev'])
    W1, b1 = pack_layer(p['w_ih_l1'], p['b_ih_l1'], p['b_hh_l1'],
                        p['w_ih_l1_rev'], p['b_ih_l1_rev'], p['b_hh_l1_rev'])
    cst[R_B0, :3 * H2] = b0
    cst[R_B1, :3 * H2] = b1
    cst[R_W0:R_W0 + E_M, :3 * H2] = W0
    cst[R_W1:R_W1 + H2, :3 * H2] = W1

    # precomputed conv validity mask, time-major rows (row = t*BB + b): 1.0 iff t <= L - k
    for t in range(L):
        for j, k in enumerate(KSIZES):
            if t <= L - k:
                cst[R_MASK + t * BB:R_MASK + (t + 1) * BB, j * K_NUM:(j + 1) * K_NUM] = 1.0

    return dict(wc=jnp.asarray(wc, jnp.bfloat16), cst=jnp.asarray(cst, jnp.float32))


# ---------------------------------------------------------------------------
# Pure-JAX (f32) reference of the same math (PyTorch semantics), for the check
# ---------------------------------------------------------------------------
def reference_forward(params, statements, metas):
    B = statements.shape[0]
    outs = []
    for k, (w, b) in zip(KSIZES, params['convs']):
        t = L - k + 1
        idx = jnp.arange(t)[:, None] + jnp.arange(k)[None, :]            # [t, k]
        win = statements[:, idx, :].reshape(B, t, k * E_S)               # [B, t, k*E_S]
        z = jnp.einsum('btf,cf->btc', win, w.reshape(K_NUM, k * E_S)) + b[None, None, :]
        outs.append(jnp.max(jnp.maximum(z, 0.0), axis=1))                # [B, K_NUM]
    conv_feat = jnp.concatenate(outs, axis=1)                            # [B, C3]

    def cell(x, w_ih, b_ih, b_hh):
        g = x @ w_ih.T + (b_ih + b_hh)[None, :]
        i = jax.nn.sigmoid(g[:, :H])
        gg = jnp.tanh(g[:, 2 * H:3 * H])
        o = jax.nn.sigmoid(g[:, 3 * H:])
        return o * jnp.tanh(i * gg)

    p = params['lstm']
    h0f = cell(metas, p['w_ih_l0'], p['b_ih_l0'], p['b_hh_l0'])
    h0b = cell(metas, p['w_ih_l0_rev'], p['b_ih_l0_rev'], p['b_hh_l0_rev'])
    x1 = jnp.concatenate([h0f, h0b], axis=1)
    h1f = cell(x1, p['w_ih_l1'], p['b_ih_l1'], p['b_hh_l1'])
    h1b = cell(x1, p['w_ih_l1_rev'], p['b_ih_l1_rev'], p['b_hh_l1_rev'])
    meta_feat = jnp.stack([h0f.max(1), h0b.max(1), h1f.max(1), h1b.max(1)], axis=1)  # [B, 4]

    all_out = jnp.concatenate([conv_feat, meta_feat], axis=1)            # [B, FEAT]
    return all_out @ params['label_w'].T + params['label_b'][None, :]


if __name__ == "__main__":
    key = jax.random.PRNGKey(0)
    k_params, k_s, k_m = jax.random.split(key, 3)
    params = init_params(k_params)
    packed = pack_params(params)                     # one-time host-side packing

    B = 16                                           # 2 grid steps of BB=8 examples
    statements = jax.random.normal(k_s, (B, L, E_S), jnp.float32)
    metas = jax.random.normal(k_m, (B, E_M), jnp.float32)

    out = cnn_with_meta_forward(packed, statements, metas)
    out = jax.block_until_ready(out)

    ref = reference_forward(params, statements, metas)
    # bf16 MXU inputs on the conv path (f32 accumulate) => slightly looser tolerance
    np.testing.assert_allclose(np.asarray(out), np.asarray(ref), rtol=2e-2, atol=2e-2)
    print("KERNEL_OK")
</pallas_src>

<mosaic_0001>
module attributes {stable_mosaic.version = 11 : i64} {
  func.func @_fused_kernel(%arg0: i32, %arg1: memref<96x64xbf16, #tpu.memory_space<vmem>>, %arg2: memref<8x8xf32, #tpu.memory_space<vmem>>, %arg3: memref<64x24xbf16, #tpu.memory_space<vmem>>, %arg4: memref<152x32xf32, #tpu.memory_space<vmem>>, %arg5: memref<8x4xf32, #tpu.memory_space<vmem>>) attributes {dimension_semantics = [#tpu.dimension_semantics<parallel>], iteration_bounds = array<i64: 2>, scalar_prefetch = 0 : i64, scratch_operands = 0 : i64, tpu.core_type = #tpu.core_type<tc>, window_params = [{transform_indices = @transform_0, window_bounds = array<i64: 96, 64>}, {transform_indices = @transform_1, window_bounds = array<i64: 8, 8>}, {pipeline_mode = #tpu.pipeline_mode<synchronous>, transform_indices = @transform_2, window_bounds = array<i64: 64, 24>}, {pipeline_mode = #tpu.pipeline_mode<synchronous>, transform_indices = @transform_3, window_bounds = array<i64: 152, 32>}, {transform_indices = @transform_4, window_bounds = array<i64: 8, 4>}]} {
    %c0 = arith.constant 0 : index
    %c0_0 = arith.constant 0 : index
    %0 = vector.load %arg1[%c0, %c0_0] : memref<96x64xbf16, #tpu.memory_space<vmem>>, vector<96x64xbf16>
    %c0_1 = arith.constant 0 : index
    %c0_2 = arith.constant 0 : index
    %1 = vector.load %arg3[%c0_1, %c0_2] : memref<64x24xbf16, #tpu.memory_space<vmem>>, vector<64x24xbf16>
    %cst = arith.constant dense<0.000000e+00> : vector<96x24xf32>
    %2 = tpu.matmul %0, %1, %cst {dimension_numbers = #tpu.dot_dimension_numbers<[1], [0], [0], [1], [0, 0, 1, 1], [], []>} : vector<96x64xbf16>, vector<64x24xbf16>, vector<96x24xf32> -> vector<96x24xf32>
    %c0_3 = arith.constant 0 : index
    %c0_4 = arith.constant 0 : index
    %3 = vector.load %arg4[%c0_3, %c0_4] : memref<152x32xf32, #tpu.memory_space<vmem>>, vector<1x24xf32>
    %c56 = arith.constant 56 : index
    %c0_5 = arith.constant 0 : index
    %4 = vector.load %arg4[%c56, %c0_5] : memref<152x32xf32, #tpu.memory_space<vmem>>, vector<96x24xf32>
    %5 = vector.broadcast %3 : vector<1x24xf32> to vector<96x24xf32>
    %6 = arith.addf %2, %5 : vector<96x24xf32>
    %cst_6 = arith.constant 0.000000e+00 : f32
    %7 = vector.broadcast %cst_6 : f32 to vector<96x24xf32>
    %8 = arith.maximumf %6, %7 : vector<96x24xf32>
    %9 = arith.mulf %8, %4 : vector<96x24xf32>
    %10 = vector.extract_strided_slice %9 {offsets = [0, 0], sizes = [8, 24], strides = [1, 1]} : vector<96x24xf32> to vector<8x24xf32>
    %11 = vector.extract_strided_slice %9 {offsets = [8, 0], sizes = [8, 24], strides = [1, 1]} : vector<96x24xf32> to vector<8x24xf32>
    %12 = arith.maximumf %10, %11 : vector<8x24xf32>
    %13 = vector.extract_strided_slice %9 {offsets = [16, 0], sizes = [8, 24], strides = [1, 1]} : vector<96x24xf32> to vector<8x24xf32>
    %14 = arith.maximumf %12, %13 : vector<8x24xf32>
    %15 = vector.extract_strided_slice %9 {offsets = [24, 0], sizes = [8, 24], strides = [1, 1]} : vector<96x24xf32> to vector<8x24xf32>
    %16 = arith.maximumf %14, %15 : vector<8x24xf32>
    %17 = vector.extract_strided_slice %9 {offsets = [32, 0], sizes = [8, 24], strides = [1, 1]} : vector<96x24xf32> to vector<8x24xf32>
    %18 = arith.maximumf %16, %17 : vector<8x24xf32>
    %19 = vector.extract_strided_slice %9 {offsets = [40, 0], sizes = [8, 24], strides = [1, 1]} : vector<96x24xf32> to vector<8x24xf32>
    %20 = arith.maximumf %18, %19 : vector<8x24xf32>
    %21 = vector.extract_strided_slice %9 {offsets = [48, 0], sizes = [8, 24], strides = [1, 1]} : vector<96x24xf32> to vector<8x24xf32>
    %22 = arith.maximumf %20, %21 : vector<8x24xf32>
    %23 = vector.extract_strided_slice %9 {offsets = [56, 0], sizes = [8, 24], strides = [1, 1]} : vector<96x24xf32> to vector<8x24xf32>
    %24 = arith.maximumf %22, %23 : vector<8x24xf32>
    %25 = vector.extract_strided_slice %9 {offsets = [64, 0], sizes = [8, 24], strides = [1, 1]} : vector<96x24xf32> to vector<8x24xf32>
    %26 = arith.maximumf %24, %25 : vector<8x24xf32>
    %27 = vector.extract_strided_slice %9 {offsets = [72, 0], sizes = [8, 24], strides = [1, 1]} : vector<96x24xf32> to vector<8x24xf32>
    %28 = arith.maximumf %26, %27 : vector<8x24xf32>
    %29 = vector.extract_strided_slice %9 {offsets = [80, 0], sizes = [8, 24], strides = [1, 1]} : vector<96x24xf32> to vector<8x24xf32>
    %30 = arith.maximumf %28, %29 : vector<8x24xf32>
    %31 = vector.extract_strided_slice %9 {offsets = [88, 0], sizes = [8, 24], strides = [1, 1]} : vector<96x24xf32> to vector<8x24xf32>
    %32 = arith.maximumf %30, %31 : vector<8x24xf32>
    %c0_7 = arith.constant 0 : index
    %c0_8 = arith.constant 0 : index
    %33 = vector.load %arg2[%c0_7, %c0_8] : memref<8x8xf32, #tpu.memory_space<vmem>>, vector<8x8xf32>
    %c8 = arith.constant 8 : index
    %c0_9 = arith.constant 0 : index
    %34 = vector.load %arg4[%c8, %c0_9] : memref<152x32xf32, #tpu.memory_space<vmem>>, vector<8x30xf32>
    %c2 = arith.constant 2 : index
    %c0_10 = arith.constant 0 : index
    %35 = vector.load %arg4[%c2, %c0_10] : memref<152x32xf32, #tpu.memory_space<vmem>>, vector<1x30xf32>
    %cst_11 = arith.constant dense<0.000000e+00> : vector<8x30xf32>
    %36 = tpu.matmul %33, %34, %cst_11 {dimension_numbers = #tpu.dot_dimension_numbers<[1], [0], [0], [1], [0, 0, 1, 1], [], []>} : vector<8x8xf32>, vector<8x30xf32>, vector<8x30xf32> -> vector<8x30xf32>
    %37 = vector.broadcast %35 : vector<1x30xf32> to vector<8x30xf32>
    %38 = arith.addf %36, %37 : vector<8x30xf32>
    %39 = vector.extract_strided_slice %38 {offsets = [0, 0], sizes = [8, 10], strides = [1, 1]} : vector<8x30xf32> to vector<8x10xf32>
    %40 = vector.extract_strided_slice %38 {offsets = [0, 10], sizes = [8, 10], strides = [1, 1]} : vector<8x30xf32> to vector<8x10xf32>
    %41 = vector.extract_strided_slice %38 {offsets = [0, 20], sizes = [8, 10], strides = [1, 1]} : vector<8x30xf32> to vector<8x10xf32>
    %42 = arith.negf %41 : vector<8x10xf32>
    %43 = math.exp %42 : vector<8x10xf32>
    %cst_12 = arith.constant 1.000000e+00 : f32
    %44 = vector.broadcast %cst_12 : f32 to vector<8x10xf32>
    %45 = arith.addf %44, %43 : vector<8x10xf32>
    %46 = arith.divf %44, %45 : vector<8x10xf32>
    %47 = arith.negf %39 : vector<8x10xf32>
    %48 = math.exp %47 : vector<8x10xf32>
    %cst_13 = arith.constant 1.000000e+00 : f32
    %49 = vector.broadcast %cst_13 : f32 to vector<8x10xf32>
    %50 = arith.addf %49, %48 : vector<8x10xf32>
    %51 = arith.divf %49, %50 : vector<8x10xf32>
    %52 = math.tanh %40 : vector<8x10xf32>
    %53 = arith.mulf %51, %52 : vector<8x10xf32>
    %54 = math.tanh %53 : vector<8x10xf32>
    %55 = arith.mulf %46, %54 : vector<8x10xf32>
    %c16 = arith.constant 16 : index
    %c0_14 = arith.constant 0 : index
    %56 = vector.load %arg4[%c16, %c0_14] : memref<152x32xf32, #tpu.memory_space<vmem>>, vector<10x30xf32>
    %c3 = arith.constant 3 : index
    %c0_15 = arith.constant 0 : index
    %57 = vector.load %arg4[%c3, %c0_15] : memref<152x32xf32, #tpu.memory_space<vmem>>, vector<1x30xf32>
    %cst_16 = arith.constant dense<0.000000e+00> : vector<8x30xf32>
    %58 = tpu.matmul %55, %56, %cst_16 {dimension_numbers = #tpu.dot_dimension_numbers<[1], [0], [0], [1], [0, 0, 1, 1], [], []>} : vector<8x10xf32>, vector<10x30xf32>, vector<8x30xf32> -> vector<8x30xf32>
    %59 = vector.broadcast %57 : vector<1x30xf32> to vector<8x30xf32>
    %60 = arith.addf %58, %59 : vector<8x30xf32>
    %61 = vector.extract_strided_slice %60 {offsets = [0, 0], sizes = [8, 10], strides = [1, 1]} : vector<8x30xf32> to vector<8x10xf32>
    %62 = vector.extract_strided_slice %60 {offsets = [0, 10], sizes = [8, 10], strides = [1, 1]} : vector<8x30xf32> to vector<8x10xf32>
    %63 = vector.extract_strided_slice %60 {offsets = [0, 20], sizes = [8, 10], strides = [1, 1]} : vector<8x30xf32> to vector<8x10xf32>
    %64 = arith.negf %63 : vector<8x10xf32>
    %65 = math.exp %64 : vector<8x10xf32>
    %cst_17 = arith.constant 1.000000e+00 : f32
    %66 = vector.broadcast %cst_17 : f32 to vector<8x10xf32>
    %67 = arith.addf %66, %65 : vector<8x10xf32>
    %68 = arith.divf %66, %67 : vector<8x10xf32>
    %69 = arith.negf %61 : vector<8x10xf32>
    %70 = math.exp %69 : vector<8x10xf32>
    %cst_18 = arith.constant 1.000000e+00 : f32
    %71 = vector.broadcast %cst_18 : f32 to vector<8x10xf32>
    %72 = arith.addf %71, %70 : vector<8x10xf32>
    %73 = arith.divf %71, %72 : vector<8x10xf32>
    %74 = math.tanh %62 : vector<8x10xf32>
    %75 = arith.mulf %73, %74 : vector<8x10xf32>
    %76 = math.tanh %75 : vector<8x10xf32>
    %77 = arith.mulf %68, %76 : vector<8x10xf32>
    %78 = vector.extract_strided_slice %55 {offsets = [0, 0], sizes = [8, 5], strides = [1, 1]} : vector<8x10xf32> to vector<8x5xf32>
    %cst_19 = arith.constant dense<0xFF800000> : vector<8xf32>
    %79 = vector.multi_reduction <maximumf>, %78, %cst_19 [1] : vector<8x5xf32> to vector<8xf32>
    %80 = vector.shape_cast %79 : vector<8xf32> to vector<8x1xf32>
    %81 = vector.extract_strided_slice %55 {offsets = [0, 5], sizes = [8, 5], strides = [1, 1]} : vector<8x10xf32> to vector<8x5xf32>
    %cst_20 = arith.constant dense<0xFF800000> : vector<8xf32>
    %82 = vector.multi_reduction <maximumf>, %81, %cst_20 [1] : vector<8x5xf32> to vector<8xf32>
    %83 = vector.shape_cast %82 : vector<8xf32> to vector<8x1xf32>
    %84 = vector.extract_strided_slice %77 {offsets = [0, 0], sizes = [8, 5], strides = [1, 1]} : vector<8x10xf32> to vector<8x5xf32>
    %cst_21 = arith.constant dense<0xFF800000> : vector<8xf32>
    %85 = vector.multi_reduction <maximumf>, %84, %cst_21 [1] : vector<8x5xf32> to vector<8xf32>
    %86 = vector.shape_cast %85 : vector<8xf32> to vector<8x1xf32>
    %87 = vector.extract_strided_slice %77 {offsets = [0, 5], sizes = [8, 5], strides = [1, 1]} : vector<8x10xf32> to vector<8x5xf32>
    %cst_22 = arith.constant dense<0xFF800000> : vector<8xf32>
    %88 = vector.multi_reduction <maximumf>, %87, %cst_22 [1] : vector<8x5xf32> to vector<8xf32>
    %89 = vector.shape_cast %88 : vector<8xf32> to vector<8x1xf32>
    %90 = tpu.concatenate %80, %83, %86, %89 in 1 : vector<8x1xf32>, vector<8x1xf32>, vector<8x1xf32>, vector<8x1xf32> -> vector<8x4xf32>
    %c32 = arith.constant 32 : index
    %c0_23 = arith.constant 0 : index
    %91 = vector.load %arg4[%c32, %c0_23] : memref<152x32xf32, #tpu.memory_space<vmem>>, vector<24x4xf32>
    %c4 = arith.constant 4 : index
    %c0_24 = arith.constant 0 : index
    %92 = vector.load %arg4[%c4, %c0_24] : memref<152x32xf32, #tpu.memory_space<vmem>>, vector<4x4xf32>
    %c1 = arith.constant 1 : index
    %c0_25 = arith.constant 0 : index
    %93 = vector.load %arg4[%c1, %c0_25] : memref<152x32xf32, #tpu.memory_space<vmem>>, vector<1x4xf32>
    %cst_26 = arith.constant dense<0.000000e+00> : vector<8x4xf32>
    %94 = tpu.matmul %32, %91, %cst_26 {dimension_numbers = #tpu.dot_dimension_numbers<[1], [0], [0], [1], [0, 0, 1, 1], [], []>} : vector<8x24xf32>, vector<24x4xf32>, vector<8x4xf32> -> vector<8x4xf32>
    %cst_27 = arith.constant dense<0.000000e+00> : vector<8x4xf32>
    %95 = tpu.matmul %90, %92, %cst_27 {dimension_numbers = #tpu.dot_dimension_numbers<[1], [0], [0], [1], [0, 0, 1, 1], [], []>} : vector<8x4xf32>, vector<4x4xf32>, vector<8x4xf32> -> vector<8x4xf32>
    %96 = arith.addf %94, %95 : vector<8x4xf32>
    %97 = vector.broadcast %93 : vector<1x4xf32> to vector<8x4xf32>
    %98 = arith.addf %96, %97 : vector<8x4xf32>
    %c0_28 = arith.constant 0 : index
    %c0_29 = arith.constant 0 : index
    %99 = vector.load %arg5[%c0_28, %c0_29] : memref<8x4xf32, #tpu.memory_space<vmem>>, vector<8x4xf32>
    tpu.vector_store %arg5[%c0_28, %c0_29], %98 {strides = array<i32>} : memref<8x4xf32, #tpu.memory_space<vmem>>, vector<8x4xf32>,
    return
  }
  func.func @transform_0(%arg0: i32) -> (i32, i32) {
    %c0_i32 = arith.constant 0 : i32
    %c0_i32_0 = arith.constant 0 : i32
    return %arg0, %c0_i32 : i32, i32
  }
  func.func @transform_1(%arg0: i32) -> (i32, i32) {
    %c0_i32 = arith.constant 0 : i32
    %c0_i32_0 = arith.constant 0 : i32
    return %arg0, %c0_i32 : i32, i32
  }
  func.func @transform_2(%arg0: i32) -> (i32, i32) {
    %c0_i32 = arith.constant 0 : i32
    %c0_i32_0 = arith.constant 0 : i32
    %c0_i32_1 = arith.constant 0 : i32
    return %c0_i32, %c0_i32_0 : i32, i32
  }
  func.func @transform_3(%arg0: i32) -> (i32, i32) {
    %c0_i32 = arith.constant 0 : i32
    %c0_i32_0 = arith.constant 0 : i32
    %c0_i32_1 = arith.constant 0 : i32
    return %c0_i32, %c0_i32_0 : i32, i32
  }
  func.func @transform_4(%arg0: i32) -> (i32, i32) {
    %c0_i32 = arith.constant 0 : i32
    %c0_i32_0 = arith.constant 0 : i32
    return %arg0, %c0_i32 : i32, i32
  }
}

</mosaic_0001>

<bundles_post_ra>
// kernel: cnn_with_meta_forward.1
= control target key start
LH: loop header
LB: loop body
LE: loop exit
PB: predicated region body
PF: predicated region fallthrough
CT: control target
= control target key end

     0   :  { %s1087_s15 = smov 0   ;;  %s1243_s0 = inlined_call_operand.vmem [shape: bf16[192,64], index: 0, kind: input, shape index: {}]   ;;  %s1244_s1 = inlined_call_operand.vmem [shape: f32[16,8], index: 1, kind: input, shape index: {}]   ;;  %s1245_s2 = inlined_call_operand.vmem [shape: bf16[64,24], index: 2, kind: input, shape index: {}]   ;;  %s1246_s3 = inlined_call_operand.vmem [shape: f32[152,32], index: 3, kind: input, shape index: {}]   ;;  %s1247_s4 = inlined_call_operand.vmem [shape: f32[16,4], index: 4, kind: output, shape index: {}]  }
   0x1 LB: > { %s1093_s16 = sadd.s32 4294967295, %s1053_s15   ;;  %p898_p0 = scmp.ge.s32.totalorder %s1053_s15, 1  ;;  %s1053_s15 = sphi %s1087_s15, %s14_s15  }
   0x2   : > { %p172_p1 = scmp.lt.s32.totalorder %s1053_s15, 3 }
   0x4   : > { %p173_p2 = pnand %p898_p0, %p172_p1 }
   0x5   : > { %v443_v0 = vld [vmem:[%s1246_s3 + $0x8] sm:$0xff] (!%p173_p2)  ;;  %p207_p3 = scmp.lt.s32.totalorder (!%p173_p2), %s1093_s16, 1  ;;  %v1055_v1 = vmov (!%p173_p2), 0.0   ;;  %vm1056_vm0 = vmmov (!%p173_p2), 0   ;;  %vm449_vm1 = vcmask (!%p173_p2), 64512   ;;  %s1057_s26 = smov (!%p173_p2), 118  }
   0x6   : > { %176 = sbr.rel (%p173_p2) target bundleno = 1441 (0x5a1), region = 36  ;;  %973 = vmatprep.subr.mxu1 (!%p173_p2), %v1055_v1  ;;  %975 = vmatprep.mubr.msk.f32.mxu1 (!%p173_p2), %vm1056_vm0, %v1055_v1  ;;  %v919_v3 = vld [vmem:[%s1246_s3 + $0x2] ss:$0 sm:$0xff] (!%p173_p2)  ;;  %v541_v14 = vld [vmem:[%s1246_s3 + $0x10] sm:$0xff] (!%p173_p2)  ;;  %v542_v15 = vld [vmem:[%s1246_s3 + $0x18] sm:$0x3] (!%p173_p2) }
   0x7   : > { %974 = vmatpush3.msra.mxu1 (!%p173_p2), %v443_v0  ;;  %vm554_vm2 = vcmask (!%p173_p2), 1041408   ;;  %v1058_v16 = vmov (!%p173_p2), 0.0|0.0   ;;  %v1000_v17 = vpack.c.bf16 (!%p173_p2), %v542_v15, %v541_v14  ;;  %vm1059_vm3 = vmmov (!%p173_p2), 1   ;;  %s1060_s5 = smov (!%p173_p2), 20   ;;  %s1061_s6 = smov (!%p173_p2), 108   ;;  %v1021_v27 = vld [vmem:[%s1245_s2] sm:$0xff] (!%p173_p2)  }
   0x8   : > { %999 = vmatprep.subr.bf16.mxu1 (!%p173_p2), %v1058_v16  ;;  %vm1001_vm4 = vmpackc.low (!%p173_p2), %vm554_vm2, %vm1059_vm3  ;;  %vm551_vm5 = vcmask (!%p173_p2), 80896   ;;  %v922_v22 = vld [vmem:[%s1246_s3 + $0x3] ss:$0 sm:$0xff] (!%p173_p2)  ;;  %v1022_v28 = vld [vmem:[%s1245_s2 + $0x8] sm:$0xff] (!%p173_p2)   ;;  %s201_s13 = smul.u32 (!%p173_p2), 12, %s1093_s16  ;;  %953 = vmatprep.subr.bf16.mxu0 (!%p173_p2), %v1021_v27  ;;  %vm307_vm6 = vcmask (!%p173_p2), 523264  }
   0x9   : > { %954 = vmatpush3.bf16.msra.mxu0 (!%p173_p2), %v1021_v27  ;;  %v1023_v29 = vld [vmem:[%s1245_s2 + $0x10] sm:$0xff] (!%p173_p2)   ;;  %v1024_v30 = vld [vmem:[%s1245_s2 + $0x18] sm:$0xff] (!%p173_p2)   ;;  %vm646_vm7 = vcmask (!%p173_p2), 203936   ;;  %vm650_vm8 = vcmask (!%p173_p2), 244936   ;;  %vm675_vm9 = vcmask (!%p173_p2), 1043456   ;;  %v239_v59 = vld [vmem:[%s1246_s3 + $0x48] sm:$0xff] (!%p173_p2) }
   0xa   : > { %p202_p4 = scmp.lt.s32.totalorder (!%p173_p2), %s201_s13, 23  ;;  %955 = vmatprep.subr.bf16.mxu0 (!%p173_p2), %v1022_v28  ;;  %v669_v46 = vld [vmem:[%s1246_s3 + $0x4] sm:$0xf] (!%p173_p2)  ;;  %v1166_v47 = vld [vmem:[%s1246_s3] ss:$0 sm:$0xff] (!%p173_p2)  ;;  %v237_v53 = vld [vmem:[%s1246_s3 + $0x38] sm:$0xff] (!%p173_p2) }
   0xb   : > { %v238_v60 = vld [vmem:[%s1246_s3 + $0x40] sm:$0xff] (!%p173_p2)  ;;  %v240_v0 = vld [vmem:[%s1246_s3 + $0x50] sm:$0xff] (!%p173_p2)  ;;  %vm660_vm10 = vcmask (!%p173_p2), 7168   ;;  %vm662_vm11 = vcmask (!%p173_p2), 15360   ;;  %vm664_vm12 = vcmask (!%p173_p2), 23552   ;;  %vm671_vm13 = vcmask (!%p173_p2), 31744  }
   0xc   : > { %vm749_vm14 = vcmask (!%p173_p2), 195584  }
   0xd   : > { %s1105_s19 = scalar_select %p207_p3, %s1093_s16, 1  ;;  %956 = vmatpush3.bf16.msra.mxu0 %v1022_v28 }
   0xe   : > { %s1249_s13 = smov (!%p202_p4, %s201_s13), 23  ;;  %957 = vmatprep.subr.bf16.mxu0 %v1023_v29 }
   0xf   : > { %s900_s20 = sshll.u32 %s1105_s19, 3  ;;  %s899_s18 = sshll.u32 %s1249_s13, 2 }
  0x10   : > { %s210_s23 = scalar_lea.vmem %s1244_s1, %s900_s20  ;;  %s205_s16 = scalar_lea.vmem %s1243_s0, %s899_s18 }
  0x11   : > { %v442_v2 = vld [vmem:[%s210_s23] sm:$0xff]  ;;  %958 = vmatpush3.bf16.msra.mxu0 %v1023_v29  ;;  %v1026_v32 = vld [vmem:[%s205_s16 + $0x8] sm:$0xff]   ;;  %v1027_v33 = vld [vmem:[%s205_s16 + $0x10] sm:$0xff]   ;;  %s214_s14 = scalar_lea.vmem %s1247_s4, %s900_s20 }
  0x12   : > { %976 = vmatmul.mubr.msk.f32.vlgmr.msra.gmra.mrb[0].mxu1 %vm449_vm1, %v442_v2  ;;  %v1025_v31 = vld [vmem:[%s205_s16] sm:$0xff]   ;;  %959 = vmatprep.subr.bf16.mxu0 %v1024_v30  ;;  %v1028_v34 = vld [vmem:[%s205_s16 + $0x18] sm:$0xff]   ;;  %v1030_v36 = vld [vmem:[%s205_s16 + $0x28] sm:$0xff]  }
  0x13   : > { %982 = vmatprep.mubr.msk.f32.mxu1 %vm1056_vm0, %v1055_v1  ;;  %1002 = vmatpush3.bf16.msk.msra.mxu1 %vm1001_vm4, %v1000_v17  ;;  %v1029_v35 = vld [vmem:[%s205_s16 + $0x20] sm:$0xff]  }
  0x14   : > { %985 = vmatprep.subr.mxu1 %v1055_v1  ;;  %961 = vmatprep.mubr.msk.bf16.mxu0 %vm307_vm6, %v1025_v31 }
  0x15   : > { %960 = vmatpush3.bf16.msra.mxu0 %v1024_v30 }
  0x18   : > { %962 = vmatmul.mubr.msk.bf16.vlgmr.msra.gmra.mrb[0].mxu0 %vm307_vm6, %v1026_v32 }
  0x19   : > { %965 = vmatprep.mubr.msk.bf16.mxu0 %vm307_vm6, %v1027_v33 }
  0x20   : > { %966 = vmatmul.mubr.msk.bf16.gmra.mrb[4].mxu0 %vm307_vm6, %v1028_v34 }
  0x21   : > { %969 = vmatprep.mubr.msk.bf16.mxu0 %vm307_vm6, %v1029_v35 }
  0x28   : > { %970 = vmatmul.mubr.msk.bf16.gmra.mrb[8].mxu0 %vm307_vm6, %v1030_v36 }
  0xe5   : > { %v519_v4 = vpop.f32.mrb[0].mxu1 }
  0xe6   : > { %v520_v5 = vadd.f32 %v919_v3, %v519_v4  ;;  %v977_v6 = vpop.f32.mrb[1].mxu1 }
  0xe8   : > { %1031 = vtanh.f32 %v520_v5  ;;  %v921_v8 = vmul.f32 -1.442695, %v520_v5 }
  0xea   : > { %1033 = vpow2.f32 %v921_v8 }
  0xeb   : > { %v963_v48 = vpop.f32.mrb[0].mxu0 }
  0xec   : > { %v369_v49 = vadd.f32 %v963_v48, %v1166_v47  ;;  %v360_v50 = vpop.f32.mrb[1].mxu0  ;;  %v246_v48 = vld [vmem:[%s1246_s3 + $0x80] sm:$0xff] }
  0xed   : > { %v361_v51 = vadd.f32 %v1166_v47, %v360_v50  ;;  %v964_v52 = vpop.f32.mrb[2].mxu0 }
  0xee   : > { %v372_v54 = vadd.f32 %v964_v52, %v1166_v47  ;;  %v363_v55 = vpop.f32.mrb[3].mxu0  ;;  %v409_v56 = vmax.f32 %v369_v49, 0.0 }
  0xef   : > { %v407_v57 = vmax.f32 %v361_v51, 0.0  ;;  %v364_v58 = vadd.f32 %v1166_v47, %v363_v55 }
  0xf0   : > { %v410_v62 = vmax.f32 %v372_v54, 0.0  ;;  %v421_v2 = vmul.f32 %v409_v56, %v239_v59 }
  0xf1   : > { %v419_v61 = vmul.f32 %v407_v57, %v237_v53  ;;  %v408_v63 = vmax.f32 %v364_v58, 0.0  ;;  %v248_v53 = vld [vmem:[%s1246_s3 + $0x90] sm:$0xff] }
  0xf2   : > { %v1032_v7 = vpop.eup %1031 }
  0xf3   : > { %531 = vrot.lane.b32.xlu0 %v1032_v7, %s1057_s26  ;;  %v420_v3 = vmul.f32 %v408_v63, %v238_v60  ;;  %v967_v4 = vpop.f32.mrb[4].mxu0  ;;  %v422_v7 = vmul.f32 %v410_v62, %v240_v0  ;;  %v666_v62 = vld [vmem:[%s1246_s3 + $0x20] sm:$0xff]  ;;  %v667_v63 = vld [vmem:[%s1246_s3 + $0x28] sm:$0xff] }
  0xf4   : > { %v1034_v9 = vpop.eup %1033  ;;  %v385_v5 = vadd.f32 %v967_v4, %v1166_v47  ;;  %v376_v6 = vpop.f32.mrb[5].mxu0  ;;  %v1004_v4 = vpack.c.bf16 %v667_v63, %v666_v62 }
  0xf5   : > { %v526_v10 = vadd.f32 1.0, %v1034_v9  ;;  %v431_v8 = vmax.f32 %v419_v61, %v420_v3  ;;  %v377_v9 = vadd.f32 %v1166_v47, %v376_v6 }
  0xf6   : > { %v413_v15 = vmax.f32 %v385_v5, 0.0 }
  0xf7   : > { %1035 = vrcp.f32 %v526_v10  ;;  %v968_v10 = vpop.f32.mrb[6].mxu0  ;;  %v432_v14 = vmax.f32 %v431_v8, %v421_v2 }
 0x101   : > { %v1036_v11 = vpop.eup %1035 }
 0x165   : > { %v532_v12 = vpop.permute.xlu0 %531 }
 0x166   : > { %v534_v13 = vmul.f32 %v1036_v11, %v532_v12  ;;  %v388_v12 = vadd.f32 %v968_v10, %v1166_v47  ;;  %v929_v10 = vld [vmem:[%s1246_s3 + $0x1] ss:$0 sm:$0xff] }
 0x168   : > { %1037 = vtanh.f32 %v534_v13  ;;  %v379_v13 = vpop.f32.mrb[7].mxu0 }
 0x169   : > { %v380_v17 = vadd.f32 %v1166_v47, %v379_v13  ;;  %v971_v30 = vpop.f32.mrb[8].mxu0 }
 0x16a   : > { %v401_v33 = vadd.f32 %v971_v30, %v1166_v47  ;;  %v392_v34 = vpop.f32.mrb[9].mxu0 }
 0x172   : > { %v1038_v18 = vpop.eup %1037 }
 0x173   : > { %537 = vrot.lane.b32.xlu0 %v1038_v18, %s1060_s5  ;;  %v243_v18 = vld [vmem:[%s1246_s3 + $0x68] sm:$0xff] }
 0x174   : > { %v425_v27 = vmul.f32 %v413_v15, %v243_v18 }
 0x1e5   : > { %v538_v19 = vpop.permute.xlu0 %537 }
 0x1e6   : > { %v540_v20 = vmul.f32 %v1036_v11, %v538_v19  ;;  %v241_v11 = vld [vmem:[%s1246_s3 + $0x58] sm:$0xff]  ;;  %v242_v19 = vld [vmem:[%s1246_s3 + $0x60] sm:$0xff] }
 0x1e8   : > { %549 = vrot.lane.b32.xlu1 %v540_v20, %s1061_s6  ;;  %v647_v37 = vsel %vm646_vm7, %v540_v20, -inf  ;;  %v651_v45 = vsel %vm650_vm8, %v540_v20, -inf }
 0x25a   : > { %v550_v21 = vpop.permute.xlu1 %549 }
 0x25b   : > { %983 = vmatmul.mubr.msk.f32.vlgmr.msra.gmra.mrb[2].mxu1 %vm551_vm5, %v550_v21 }
 0x25c   : > { %987 = vmatprep.mubr.msk.f32.mxu1 %vm1056_vm0, %v1055_v1  ;;  %986 = vmatpush3.msk.msra.mxu1 %vm675_vm9, %v669_v46  ;;  %v247_v46 = vld [vmem:[%s1246_s3 + $0x88] sm:$0xff] }
 0x25d   : > { %1003 = vmatprep.subr.bf16.mxu1 %v1058_v16  ;;  %v411_v16 = vmax.f32 %v377_v9, 0.0 }
 0x25f   : > { %v423_v21 = vmul.f32 %v411_v16, %v241_v11 }
 0x32e   : > { %v624_v23 = vpop.f32.mrb[2].mxu1 }
 0x32f   : > { %v625_v24 = vadd.f32 %v922_v22, %v624_v23  ;;  %v984_v25 = vpop.f32.mrb[3].mxu1  ;;  %v433_v22 = vmax.f32 %v432_v14, %v422_v7  ;;  %v414_v23 = vmax.f32 %v388_v12, 0.0  ;;  %v668_v7 = vld [vmem:[%s1246_s3 + $0x30] sm:$0xff] }
 0x331   : > { %1039 = vtanh.f32 %v625_v24  ;;  %v925_v38 = vmul.f32 -1.442695, %v625_v24  ;;  %v412_v24 = vmax.f32 %v380_v17, 0.0  ;;  %v434_v28 = vmax.f32 %v433_v22, %v423_v21 }
 0x333   : > { %1041 = vpow2.f32 %v925_v38  ;;  %v424_v29 = vmul.f32 %v412_v24, %v242_v19  ;;  %v972_v38 = vpop.f32.mrb[10].mxu0 }
 0x335   : > { %v435_v36 = vmax.f32 %v434_v28, %v424_v29 }
 0x33b   : > { %v1040_v26 = vpop.eup %1039 }
 0x33c   : > { %636 = vrot.lane.b32.xlu1 %v1040_v26, %s1057_s26  ;;  %v244_v26 = vld [vmem:[%s1246_s3 + $0x70] sm:$0xff] }
 0x33d   : > { %v1042_v39 = vpop.eup %1041  ;;  %v426_v35 = vmul.f32 %v414_v23, %v244_v26 }
 0x33e   : > { %v631_v40 = vadd.f32 1.0, %v1042_v39  ;;  %v245_v39 = vld [vmem:[%s1246_s3 + $0x78] sm:$0xff] }
 0x340   : > { %1043 = vrcp.f32 %v631_v40  ;;  %v404_v40 = vadd.f32 %v972_v38, %v1166_v47 }
 0x342   : > { %v418_v51 = vmax.f32 %v404_v40, 0.0 }
 0x34a   : > { %v1044_v41 = vpop.eup %1043 }
 0x360   : > { %648 = vmax.xlane.f32.xlu1 %v647_v37  ;;  %v393_v37 = vadd.f32 %v1166_v47, %v392_v34 }
 0x3ae   : > { %v637_v42 = vpop.permute.xlu1 %636 }
 0x3af   : > { %v639_v43 = vmul.f32 %v1044_v41, %v637_v42  ;;  %v436_v42 = vmax.f32 %v435_v36, %v425_v27 }
 0x3b1   : > { %1045 = vtanh.f32 %v639_v43  ;;  %v417_v43 = vmax.f32 %v401_v33, 0.0  ;;  %v437_v50 = vmax.f32 %v436_v42, %v426_v35 }
 0x3b3   : > { %v429_v54 = vmul.f32 %v417_v43, %v247_v46 }
 0x3bb   : > { %v1046_v44 = vpop.eup %1045 }
 0x3bc   : > { %642 = vrot.lane.b32.xlu0 %v1046_v44, %s1060_s5  ;;  %v415_v44 = vmax.f32 %v393_v37, 0.0 }
 0x3be   : > { %v427_v49 = vmul.f32 %v415_v44, %v245_v39 }
 0x3c0   : > { %v438_v55 = vmax.f32 %v437_v50, %v427_v49 }
 0x3db   : > { %652 = vmax.xlane.f32.xlu0 %v651_v45 }
 0x3ed   : > { %v649_v60 = vpop.xlane.xlu1 %648 }
 0x42e   : > { %v643_v20 = vpop.permute.xlu0 %642 }
 0x42f   : > { %v645_v25 = vmul.f32 %v1044_v41, %v643_v20  ;;  %v395_v41 = vpop.f32.mrb[11].mxu0 }
 0x430   : > { %v396_v45 = vadd.f32 %v1166_v47, %v395_v41  ;;  %v430_v47 = vmul.f32 %v418_v51, %v248_v53 }
 0x431   : > { %v657_v31 = vsel %vm650_vm8, %v645_v25, -inf  ;;  %v654_v32 = vsel %vm646_vm7, %v645_v25, -inf }
 0x432   : > { %658 = vmax.xlane.f32.xlu1 %v657_v31  ;;  %655 = vmax.xlane.f32.xlu0 %v654_v32  ;;  %v416_v52 = vmax.f32 %v396_v45, 0.0 }
 0x434   : > { %v428_v56 = vmul.f32 %v416_v52, %v246_v48 }
 0x436   : > { %v439_v57 = vmax.f32 %v438_v55, %v428_v56 }
 0x438   : > { %v440_v58 = vmax.f32 %v439_v57, %v429_v54 }
 0x43a   : > { %v441_v59 = vmax.f32 %v440_v58, %v430_v47 }
 0x468   : > { %v653_v61 = vpop.xlane.xlu0 %652 }
 0x469   : > { %v661_v0 = vsel %vm660_vm10, %v649_v60, %v653_v61 }
 0x4bf   : > { %v659_v2 = vpop.xlane.xlu1 %658  ;;  %v656_v3 = vpop.xlane.xlu0 %655 }
 0x4c0   : > { %v663_v5 = vsel %vm662_vm11, %v661_v0, %v656_v3 }
 0x4c1   : > { %v665_v6 = vsel %vm664_vm12, %v663_v5, %v659_v2 }
 0x4c2   : > { %988 = vmatmul.mubr.msk.f32.vlgmr.msra.gmra.mrb[4].mxu1 %vm671_vm13, %v665_v6 }
 0x4c3   : > { %1005 = vmatpush3.bf16.msra.mxu1 %v1004_v4  ;;  %996 = vmatprep.mubr.msk.f32.mxu1 %vm1056_vm0, %v1055_v1 }
 0x4c4   : > { %994 = vmatprep.subr.mxu1 %v1055_v1 }
 0x4c7   : > { %995 = vmatpush3.msra.mxu1 %v668_v7 }
 0x4c8   : > { %997 = vmatmul.mubr.msk.f32.vlgmr.msra.gmra.mrb[6].mxu1 %vm749_vm14, %v441_v59 }
 0x595   : > { %v745_v8 = vpop.f32.mrb[4].mxu1 }
 0x596   : > { %v989_v9 = vpop.f32.mrb[5].mxu1 }
 0x59b   : > { %v819_v11 = vpop.f32.mrb[6].mxu1 }
 0x59c   : > { %v820_v12 = vadd.f32 %v819_v11, %v745_v8  ;;  %v998_v13 = vpop.f32.mrb[7].mxu1 }
 0x59e   : > { %v827_v1 = vadd.f32 %v929_v10, %v820_v12 }
 0x5a0   : > { %828 = vst.msk [vmem:[%s214_s14] sm:$0xff] %vm671_vm13, %v827_v1 }
 0x5a1 PF: > { %s14_s15 = sadd.s32 1, %s1053_s15  }
 0x5a2   : > { %p11_p5 = scmp.ge.s32.totalorder %s14_s15, 4  }
 0x5a4   :  { %13 = sbr.rel (!%p11_p5) target bundleno = 1 (0x1), region = 69 }

</bundles_post_ra>
